<compile_context>
chip_gen: v7x
topology: tpu7x:2x2x1
jax: 0.10.0
libtpu: 0.0.40
codegen_flags: <defaults>
</compile_context>

<pallas_src>
import jax
import jax.numpy as jnp
from jax.experimental import pallas as pl
from jax.experimental.pallas import tpu as pltpu

INPUT_LENGTH = 64

_LANES = 512                   # lane-dense last dim (multiple of 128)
_MAX_TILE_ROWS = 2048          # 2048 x 512 f32 tile = 4 MiB per buffer
_PALLAS_MIN_BYTES = 4 << 20    # below this, plain (fused) XLA is strictly faster
_VMEM_LIMIT_BYTES = 32 << 20   # raise v5e's 16 MiB scoped default for 4 MiB blocks


def _uler_kernel(x_ref, o_ref):
    # Elementwise hot path: relu(-x), with a dtype-matched zero.
    x = x_ref[...]
    o_ref[...] = jnp.maximum(-x, jnp.zeros((), dtype=x.dtype))


def _choose_tile_rows(rows: int) -> int:
    """Pick tile rows: a multiple-of-8 exact divisor of `rows`, <= _MAX_TILE_ROWS,
    giving >= 2 grid steps when possible (v7x 2-TC sharding). Falls back to a
    single full-array block (block == full dims satisfies the (8,128) rule)."""
    if rows < 16 or rows % 8 != 0:
        return rows
    t = min(_MAX_TILE_ROWS, rows // 2)
    t -= t % 8
    while t >= 8:
        if rows % t == 0:
            return t
        t -= 8
    return rows


def _uler_pallas(x: jax.Array) -> jax.Array:
    """Copy-free, lane-dense, tiled Pallas path for relu(-x).

    Precondition: x.size % _LANES == 0 (checked by the dispatcher), so the
    flatten/reshape below is a pure bitcast — no pad, no slice.
    """
    orig_shape = x.shape
    dtype = x.dtype
    n = x.size
    rows = n // _LANES

    tile_rows = _choose_tile_rows(rows)
    grid = (rows // tile_rows,)

    x2 = x.reshape(rows, _LANES)
    itemsize = jnp.dtype(dtype).itemsize

    out = pl.pallas_call(
        _uler_kernel,
        out_shape=jax.ShapeDtypeStruct((rows, _LANES), dtype),
        grid_spec=pltpu.PrefetchScalarGridSpec(
            num_scalar_prefetch=0,
            grid=grid,
            in_specs=[pl.BlockSpec((tile_rows, _LANES), lambda i: (i, 0))],
            out_specs=pl.BlockSpec((tile_rows, _LANES), lambda i: (i, 0)),
        ),
        compiler_params=pltpu.CompilerParams(
            dimension_semantics=("parallel",),
            vmem_limit_bytes=_VMEM_LIMIT_BYTES,
        ),
        cost_estimate=pl.CostEstimate(
            flops=2 * n, transcendentals=0, bytes_accessed=2 * n * itemsize
        ),
    )(x2)

    return out.reshape(orig_shape)


def uler_forward(x: jax.Array, *, force_pallas: bool = False) -> jax.Array:
    """ULeR.forward: relu(-x).

    Pallas is used only when the lane-dense reshape is copy-free and the input
    is large enough that kernel launch overhead is amortized; everything else
    goes through plain XLA (which fuses relu(-x) at HBM roofline anyway).
    """
    n = x.size
    nbytes = n * jnp.dtype(x.dtype).itemsize
    copy_free = (n > 0) and (n % _LANES == 0)
    if copy_free and (force_pallas or nbytes >= _PALLAS_MIN_BYTES):
        return _uler_pallas(x)
    # Ragged / tiny sizes: fused XLA path (strictly faster than pad+kernel+slice).
    return jnp.maximum(-x, jnp.zeros((), dtype=x.dtype))


if __name__ == "__main__":
    key = jax.random.PRNGKey(0)

    # Parameter for shape fidelity only (torch.zeros(INPUT_LENGTH)); unused in
    # forward(), exactly as in the PyTorch module.
    bias = jnp.zeros((INPUT_LENGTH,), dtype=jnp.float32)

    # Nominal module-sized input: (batch=8, INPUT_LENGTH=64).
    x_small = jax.random.normal(key, (8, INPUT_LENGTH), dtype=jnp.float32)
    ref_small = jnp.maximum(-x_small, 0.0)

    # 1) Default dispatch (small -> fused XLA path).
    out_wrapper = uler_forward(x_small)
    jax.block_until_ready(out_wrapper)
    assert out_wrapper.shape == ref_small.shape
    assert jnp.allclose(out_wrapper, ref_small), "wrapper path mismatch"

    # 2) Forced Pallas on the nominal shape (n=512 -> single (1, 512) block,
    #    block == full array dims).
    out_pallas_small = uler_forward(x_small, force_pallas=True)
    jax.block_until_ready(out_pallas_small)
    assert jnp.allclose(out_pallas_small, ref_small), "pallas small mismatch"

    # 3) Forced Pallas on a modestly larger batch — exercises the multi-step
    #    tiled grid (rows=512 -> tile_rows=256, grid=(2,)), still copy-free.
    x_med = jax.random.normal(jax.random.PRNGKey(0), (4096, INPUT_LENGTH),
                              dtype=jnp.float32)
    out_pallas_med = uler_forward(x_med, force_pallas=True)
    jax.block_until_ready(out_pallas_med)
    ref_med = jnp.maximum(-x_med, 0.0)
    assert out_pallas_med.shape == ref_med.shape
    assert jnp.allclose(out_pallas_med, ref_med), "pallas tiled mismatch"

    print("KERNEL_OK")
</pallas_src>

<mosaic_0001>
module attributes {stable_mosaic.version = 11 : i64} {
  func.func @_uler_kernel(%arg0: i32, %arg1: memref<1x512xf32, #tpu.memory_space<vmem>>, %arg2: memref<1x512xf32, #tpu.memory_space<vmem>>) attributes {dimension_semantics = [#tpu.dimension_semantics<parallel>], iteration_bounds = array<i64: 1>, scalar_prefetch = 0 : i64, scratch_operands = 0 : i64, tpu.core_type = #tpu.core_type<tc>, window_params = [{transform_indices = @transform_0, window_bounds = array<i64: 1, 512>}, {transform_indices = @transform_1, window_bounds = array<i64: 1, 512>}]} {
    %c0 = arith.constant 0 : index
    %c0_0 = arith.constant 0 : index
    %0 = vector.load %arg1[%c0, %c0_0] : memref<1x512xf32, #tpu.memory_space<vmem>>, vector<1x512xf32>
    %cst = arith.constant 0.000000e+00 : f32
    %1 = vector.broadcast %cst : f32 to vector<1x512xf32>
    %2 = arith.subf %1, %0 : vector<1x512xf32>
    %cst_1 = arith.constant 0.000000e+00 : f32
    %3 = vector.broadcast %cst_1 : f32 to vector<1x512xf32>
    %4 = arith.maximumf %2, %3 : vector<1x512xf32>
    %c0_2 = arith.constant 0 : index
    %c0_3 = arith.constant 0 : index
    %5 = vector.load %arg2[%c0_2, %c0_3] : memref<1x512xf32, #tpu.memory_space<vmem>>, vector<1x512xf32>
    tpu.vector_store %arg2[%c0_2, %c0_3], %4 {strides = array<i32>} : memref<1x512xf32, #tpu.memory_space<vmem>>, vector<1x512xf32>,
    return
  }
  func.func @transform_0(%arg0: i32) -> (i32, i32) {
    %c0_i32 = arith.constant 0 : i32
    %c0_i32_0 = arith.constant 0 : i32
    return %arg0, %c0_i32 : i32, i32
  }
  func.func @transform_1(%arg0: i32) -> (i32, i32) {
    %c0_i32 = arith.constant 0 : i32
    %c0_i32_0 = arith.constant 0 : i32
    return %arg0, %c0_i32 : i32, i32
  }
}

</mosaic_0001>

<bundles_post_ra>
// kernel: tpu_custom_call.1
= control target key start
LH: loop header
LB: loop body
LE: loop exit
PB: predicated region body
PF: predicated region fallthrough
CT: control target
= control target key end

     0   :  { %6 = vsyncpa [#allocation3], 0  ;;  %s130_s0 = inlined_call_operand.hbm [shape: f32[1,512], index: 0, kind: input, shape index: {}]   ;;  %s131_s1 = inlined_call_operand.hbm [shape: f32[1,512], index: 1, kind: output, shape index: {}]  }
   0x1   :  { %7 = vsyncpa [#allocation4], 0  ;;  %s94_s6 = smov [#allocation2]   ;;  %s46_s10 = scalar_lea.hbm %s130_s0, 64 }
   0x2   :  { %s14_s7 = sshll.u32 %s94_s6, 4  ;;  %p47_p0 = scmp.ne.s32.totalorder %s130_s0, %s46_s10  ;;  %s15_s7 = int_to_ptr.vmem [resolvable:$true] %s14_s7 }
   0x3   :  { %p50_p1 = scmp.lt.u32.totalorder %s46_s10, %s130_s0 }
   0x5   :  { %p52_p2 = pnand %p50_p1, %p47_p0 }
   0x7   :  { %55 = shalt.err (!%p52_p2)
}
   0x8   :  { %s56_s15 = scalar_lea.vmem %s15_s7, 64  ;;  %p61_p4 = scmp.lt.s32.totalorder %s15_s7, %s15_s7 }
   0x9   :  { %p57_p3 = scmp.ne.s32.totalorder %s15_s7, %s56_s15  ;;  %p62_p5 = scmp.lt.s32.totalorder %s56_s15, %s56_s15 }
   0xb   :  { %p63_p6 = por %p62_p5, %p61_p4 }
   0xd   :  { %p64_p7 = pnand %p63_p6, %p57_p3 }
   0xf   :  { %67 = shalt.err (!%p64_p7)
}
  0x10   :  { %17 = dma.hbm_to_vmem [thread:$0]  %s130_s0, 64, %s15_s7, [#allocation3]  }
  0x11   :  { %90 = dma.done.wait [#allocation3], 64  }
  0x12   :  { %91 = vsyncadd [#allocation3], 4294967232  ;;  %v24_v0 = vlaneseq  ;;  %v21_v1 = vld [vmem:[#allocation2] sm:$0xf]  ;;  %s95_s18 = smov [#allocation5]  }
  0x13   :  { %s35_s19 = sshll.u32 %s95_s18, 4  ;;  %v22_v2 = vsub.f32 0.0, %v21_v1  ;;  %s36_s19 = int_to_ptr.vmem [resolvable:$true] %s35_s19 }
  0x14   :  { %vm26_vm0 = vcmp.lt.s32.totalorder %v24_v0, 512  ;;  %s68_s20 = scalar_lea.vmem %s36_s19, 64  ;;  %p73_p9 = scmp.lt.s32.totalorder %s36_s19, %s36_s19 }
  0x15   :  { %v23_v3 = vmax.f32 %v22_v2, 0.0  ;;  %p69_p8 = scmp.ne.s32.totalorder %s36_s19, %s68_s20  ;;  %p74_p10 = scmp.lt.s32.totalorder %s68_s20, %s68_s20 }
  0x17   :  { %28 = vst.msk [vmem:[#allocation5] sm:$0xf] %vm26_vm0, %v23_v3  ;;  %p75_p11 = por %p74_p10, %p73_p9 }
  0x19   :  { %p76_p12 = pnand %p75_p11, %p69_p8 }
  0x1b   :  { %79 = shalt.err (!%p76_p12)
}
  0x1c   :  { %s80_s22 = scalar_lea.hbm %s131_s1, 64 }
  0x1d   :  { %p81_p13 = scmp.ne.s32.totalorder %s131_s1, %s80_s22  ;;  %p84_p0 = scmp.lt.u32.totalorder %s80_s22, %s131_s1 }
  0x1f   :  { %p86_p1 = pnand %p84_p0, %p81_p13 }
  0x21   :  { %89 = shalt.err (!%p86_p1)
}
  0x22   :  { %38 = dma.vmem_to_hbm [thread:$0]  %s36_s19, 64, %s131_s1, [#allocation4]  }
  0x23   :  { %92 = dma.done.wait [#allocation4], 64  }
  0x24   :  { %93 = vsyncadd [#allocation4], 4294967232 }
  0x25   :  { %42 = vsyncpa [#allocation3], 1 }
  0x26   :  { %43 = vsyncpa [#allocation4], 1 }

</bundles_post_ra>
